<compile_context>
chip_gen: v7x
topology: tpu7x:2x2x1
jax: 0.10.0
libtpu: 0.0.40
codegen_flags: <defaults>
</compile_context>

<pallas_src>
import functools

import jax
import jax.numpy as jnp
from jax import lax
from jax.experimental import pallas as pl
from jax.experimental.pallas import tpu as pltpu


def _round_up(n, m):
    return ((n + m - 1) // m) * m


def _cdiv(a, b):
    return (a + b - 1) // b


def _vmem_capacity_bytes():
    """Physical VMEM of the current TPU generation (conservative fallback)."""
    try:
        info = pltpu.get_tpu_info()
        cap = getattr(info, "vmem_capacity_bytes", None)
        if cap:
            return int(cap)
    except Exception:
        pass
    return 64 * 1024 * 1024  # v7x per-TensorCore VMEM (smallest of v5e/v6e/v7x)


def _vmem_budget_bytes(depth, dim, tm, act_bytes, mm_bytes, single_buf_params):
    """Rough VMEM footprint estimate for one grid step."""
    param_bufs = 1 if single_buf_params else 2
    weights = depth * dim * dim * mm_bytes * param_bufs
    biases = depth * dim * 4 * param_bufs
    io = 2 * 2 * tm * dim * act_bytes          # x + out, each double-buffered
    temps = 4 * tm * dim * 4                   # f32 x / pre / gate / headroom
    return weights + biases + io + temps


def _gateloop_kernel(x_ref, wt_ref, b_ref, o_ref, *, depth, matmul_dtype, approx_recip):
    # x_ref : (tm, D)        -- row tile of the flattened (B*S, D) input
    # wt_ref: (depth, D, D)  -- pre-transposed weights (W.T), resident across grid
    # b_ref : (depth, 1, D)  -- biases (f32)
    # o_ref : (tm, D)
    x0 = x_ref[...].astype(jnp.float32)

    def layer(d, x):
        w = wt_ref[d]                                  # (D, D), already W.T
        b = b_ref[d].astype(jnp.float32)               # (1, D)
        pre = jnp.dot(x.astype(matmul_dtype), w,
                      preferred_element_type=jnp.float32) + b
        # sigmoid(pre) = 1 / (1 + exp(-pre)); exp (+ approx reciprocal) run on the
        # EUP slot, free filler next to the MXU/VPU work.
        gate = pl.reciprocal(1.0 + jnp.exp(-pre), approx=approx_recip)
        return x * gate

    x = lax.fori_loop(0, depth, layer, x0)
    o_ref[...] = x.astype(o_ref.dtype)


def gateloop_block(x, weights, biases, *, tm=512, matmul_dtype=jnp.bfloat16,
                   io_dtype=None, approx_recip=True):
    """GateLoopBlock forward.

    x:       (B, S, D)
    weights: (depth, D, D)  -- PyTorch nn.Linear layout (out, in): y = x @ W.T + b
    biases:  (depth, D)
    io_dtype: optional dtype for the x/out HBM streams (e.g. jnp.bfloat16 for the
              HBM-bound small-D regime); math inside the kernel stays f32.
    """
    B, S, D = x.shape
    depth, out_d, in_d = weights.shape
    assert out_d == D and in_d == D

    io_dtype = x.dtype if io_dtype is None else io_dtype
    act_bytes = jnp.dtype(io_dtype).itemsize
    mm_bytes = jnp.dtype(matmul_dtype).itemsize
    M = B * S

    # --- Generation-aware VMEM budget: clamp the requested row tile. ---
    cap = _vmem_capacity_bytes()
    budget_cap = int(cap * 0.85)
    tm_req = max(8, min(tm, _round_up(M, 8)))
    while tm_req > 8 and _vmem_budget_bytes(depth, D, tm_req, act_bytes,
                                            mm_bytes, True) > budget_cap:
        tm_req = max(8, tm_req // 2)

    # --- Balanced ragged-M tiling; >=2 tiles so both v7x TensorCores get work. ---
    num_tiles = _cdiv(M, tm_req)
    if M >= 16:
        num_tiles = max(num_tiles, 2)
    tm_eff = _round_up(_cdiv(M, num_tiles), 8)
    M_pad = tm_eff * num_tiles

    # Scoped VMEM limit: enough for the worst case (double-buffered params), but
    # never above ~85% of this generation's physical VMEM.
    required_worst = _vmem_budget_bytes(depth, D, tm_eff, act_bytes, mm_bytes, False)
    vmem_limit_bytes = min(budget_cap, max(int(1.5 * required_worst), 32 * 1024 * 1024))

    x2d = x.reshape(M, D).astype(io_dtype)
    if M_pad != M:
        x2d = jnp.pad(x2d, ((0, M_pad - M), (0, 0)))

    # Hoist W.T out of the kernel (one-time XLA transpose) and cast to the
    # MXU-native dtype. Bias stays f32 (added post-accumulation).
    wt = jnp.transpose(weights, (0, 2, 1)).astype(matmul_dtype)
    b3d = biases.reshape(depth, 1, D).astype(jnp.float32)

    kernel = functools.partial(_gateloop_kernel, depth=depth,
                               matmul_dtype=matmul_dtype, approx_recip=approx_recip)

    cost = pl.CostEstimate(
        flops=2 * depth * M_pad * D * D,
        transcendentals=2 * depth * M_pad * D,
        bytes_accessed=2 * M_pad * D * act_bytes + depth * D * D * mm_bytes + depth * D * 4,
    )

    def _call(single_buf_params):
        param_kw = dict(pipeline_mode=pl.Buffered(1)) if single_buf_params else {}
        grid_spec = pltpu.PrefetchScalarGridSpec(
            num_scalar_prefetch=0,
            grid=(num_tiles,),
            in_specs=[
                pl.BlockSpec((tm_eff, D), lambda i: (i, 0)),
                # Constant index_map -> resident across the whole row grid.
                pl.BlockSpec((depth, D, D), lambda i: (0, 0, 0), **param_kw),
                pl.BlockSpec((depth, 1, D), lambda i: (0, 0, 0), **param_kw),
            ],
            out_specs=pl.BlockSpec((tm_eff, D), lambda i: (i, 0)),
        )
        return pl.pallas_call(
            kernel,
            out_shape=jax.ShapeDtypeStruct((M_pad, D), io_dtype),
            grid_spec=grid_spec,
            compiler_params=pltpu.CompilerParams(
                dimension_semantics=("parallel",),
                vmem_limit_bytes=vmem_limit_bytes,
            ),
            cost_estimate=cost,
        )(x2d, wt, b3d)

    try:
        out2d = _call(True)           # single-buffered resident params
    except Exception:
        out2d = _call(False)          # fallback: default double buffering

    if M_pad != M:
        out2d = out2d[:M]
    return out2d.reshape(B, S, D).astype(x.dtype)


def gateloop_block_ref(x, weights, biases):
    """Pure-JAX f32 reference matching the PyTorch forward."""
    depth = weights.shape[0]
    out = x.astype(jnp.float32)
    for d in range(depth):
        gate = jax.nn.sigmoid(out @ weights[d].T + biases[d])
        out = out * gate
    return out.astype(x.dtype)


if __name__ == "__main__":
    # Small shapes consistent with the module: (batch, seq, dim), depth layers.
    B, S, D, depth = 2, 8, 32, 2

    key = jax.random.PRNGKey(0)
    kx, kw, kb = jax.random.split(key, 3)

    x = jax.random.normal(kx, (B, S, D), dtype=jnp.float32)
    # Deterministic synthetic parameter init (nn.Linear-like uniform scale).
    bound = 1.0 / jnp.sqrt(D)
    weights = jax.random.uniform(kw, (depth, D, D), jnp.float32, -bound, bound)
    biases = jax.random.uniform(kb, (depth, D), jnp.float32, -bound, bound)

    out = gateloop_block(x, weights, biases)
    out = jax.block_until_ready(out)

    ref = gateloop_block_ref(x, weights, biases)
    assert out.shape == x.shape
    # Tolerance accounts for the bf16 matmul (f32 accumulation) + approx reciprocal;
    # re-validate (or set approx_recip=False) for deeper stacks.
    assert jnp.allclose(out, ref, atol=2e-2, rtol=2e-2), "mismatch vs reference"

    print("KERNEL_OK")
</pallas_src>

<mosaic_0001>
module attributes {stable_mosaic.version = 11 : i64} {
  func.func @_gateloop_kernel(%arg0: i32, %arg1: memref<8x32xf32, #tpu.memory_space<vmem>>, %arg2: memref<2x32x32xbf16, #tpu.memory_space<vmem>>, %arg3: memref<2x1x32xf32, #tpu.memory_space<vmem>>, %arg4: memref<8x32xf32, #tpu.memory_space<vmem>>) attributes {dimension_semantics = [#tpu.dimension_semantics<parallel>], iteration_bounds = array<i64: 2>, scalar_prefetch = 0 : i64, scratch_operands = 0 : i64, tpu.core_type = #tpu.core_type<tc>, window_params = [{transform_indices = @transform_0, window_bounds = array<i64: 8, 32>}, {pipeline_mode = #tpu.pipeline_mode<synchronous>, transform_indices = @transform_1, window_bounds = array<i64: 2, 32, 32>}, {pipeline_mode = #tpu.pipeline_mode<synchronous>, transform_indices = @transform_2, window_bounds = array<i64: 2, 1, 32>}, {transform_indices = @transform_3, window_bounds = array<i64: 8, 32>}]} {
    %c0 = arith.constant 0 : index
    %c0_0 = arith.constant 0 : index
    %0 = vector.load %arg1[%c0, %c0_0] : memref<8x32xf32, #tpu.memory_space<vmem>>, vector<8x32xf32>
    %c0_i32 = arith.constant 0 : i32
    %c2_i32 = arith.constant 2 : i32
    %1 = arith.addi %c0_i32, %c2_i32 : i32
    %c1_i32 = arith.constant 1 : i32
    %2 = scf.for %arg5 = %c0_i32 to %1 step %c1_i32 iter_args(%arg6 = %0) -> (vector<8x32xf32>)  : i32 {
      %4 = arith.index_cast %arg5 : i32 to index
      %c0_4 = arith.constant 0 : index
      %c0_5 = arith.constant 0 : index
      %5 = vector.load %arg2[%4, %c0_4, %c0_5] : memref<2x32x32xbf16, #tpu.memory_space<vmem>>, vector<1x32x32xbf16>
      %6 = vector.shape_cast %5 : vector<1x32x32xbf16> to vector<32x32xbf16>
      %7 = arith.index_cast %arg5 : i32 to index
      %c0_6 = arith.constant 0 : index
      %c0_7 = arith.constant 0 : index
      %8 = vector.load %arg3[%7, %c0_6, %c0_7] : memref<2x1x32xf32, #tpu.memory_space<vmem>>, vector<1x1x32xf32>
      %9 = vector.shape_cast %8 : vector<1x1x32xf32> to vector<1x32xf32>
      %10 = arith.truncf %arg6 : vector<8x32xf32> to vector<8x32xbf16>
      %cst = arith.constant dense<0.000000e+00> : vector<8x32xf32>
      %11 = tpu.matmul %10, %6, %cst {dimension_numbers = #tpu.dot_dimension_numbers<[1], [0], [0], [1], [0, 0, 1, 1], [], []>} : vector<8x32xbf16>, vector<32x32xbf16>, vector<8x32xf32> -> vector<8x32xf32>
      %12 = vector.broadcast %9 : vector<1x32xf32> to vector<8x32xf32>
      %13 = arith.addf %11, %12 : vector<8x32xf32>
      %cst_8 = arith.constant 0.000000e+00 : f32
      %14 = vector.broadcast %cst_8 : f32 to vector<8x32xf32>
      %15 = arith.subf %14, %13 : vector<8x32xf32>
      %16 = math.exp %15 : vector<8x32xf32>
      %cst_9 = arith.constant 1.000000e+00 : f32
      %17 = vector.broadcast %cst_9 : f32 to vector<8x32xf32>
      %18 = arith.addf %17, %16 : vector<8x32xf32>
      %19 = tpu.reciprocal %18 {approx = true} : vector<8x32xf32> -> vector<8x32xf32>
      %20 = arith.mulf %arg6, %19 : vector<8x32xf32>
      scf.yield %20 : vector<8x32xf32>
    }
    %c2_i32_1 = arith.constant 2 : i32
    %c0_2 = arith.constant 0 : index
    %c0_3 = arith.constant 0 : index
    %3 = vector.load %arg4[%c0_2, %c0_3] : memref<8x32xf32, #tpu.memory_space<vmem>>, vector<8x32xf32>
    tpu.vector_store %arg4[%c0_2, %c0_3], %2 {strides = array<i32>} : memref<8x32xf32, #tpu.memory_space<vmem>>, vector<8x32xf32>,
    return
  }
  func.func @transform_0(%arg0: i32) -> (i32, i32) {
    %c0_i32 = arith.constant 0 : i32
    %c0_i32_0 = arith.constant 0 : i32
    return %arg0, %c0_i32 : i32, i32
  }
  func.func @transform_1(%arg0: i32) -> (i32, i32, i32) {
    %c0_i32 = arith.constant 0 : i32
    %c0_i32_0 = arith.constant 0 : i32
    %c0_i32_1 = arith.constant 0 : i32
    %c0_i32_2 = arith.constant 0 : i32
    return %c0_i32, %c0_i32_0, %c0_i32_1 : i32, i32, i32
  }
  func.func @transform_2(%arg0: i32) -> (i32, i32, i32) {
    %c0_i32 = arith.constant 0 : i32
    %c0_i32_0 = arith.constant 0 : i32
    %c0_i32_1 = arith.constant 0 : i32
    %c0_i32_2 = arith.constant 0 : i32
    return %c0_i32, %c0_i32_0, %c0_i32_1 : i32, i32, i32
  }
  func.func @transform_3(%arg0: i32) -> (i32, i32) {
    %c0_i32 = arith.constant 0 : i32
    %c0_i32_0 = arith.constant 0 : i32
    return %arg0, %c0_i32 : i32, i32
  }
}

module attributes {stable_mosaic.version = 11 : i64} {
  func.func @_gateloop_kernel(%arg0: i32, %arg1: memref<8x32xf32, #tpu.memory_space<vmem>>, %arg2: memref<2x32x32xbf16, #tpu.memory_space<vmem>>, %arg3: memref<2x1x32xf32, #tpu.memory_space<vmem>>, %arg4: memref<8x32xf32, #tpu.memory_space<vmem>>) attributes {dimension_semantics = [#tpu.dimension_semantics<parallel>], iteration_bounds = array<i64: 2>, scalar_prefetch = 0 : i64, scratch_operands = 0 : i64, tpu.core_type = #tpu.core_type<tc>, window_params = [{transform_indices = @transform_0, window_bounds = array<i64: 8, 32>}, {pipeline_mode = #tpu.pipeline_mode<synchronous>, transform_indices = @transform_1, window_bounds = array<i64: 2, 32, 32>}, {pipeline_mode = #tpu.pipeline_mode<synchronous>, transform_indices = @transform_2, window_bounds = array<i64: 2, 1, 32>}, {transform_indices = @transform_3, window_bounds = array<i64: 8, 32>}]} {
    %c0 = arith.constant 0 : index
    %c0_0 = arith.constant 0 : index
    %0 = vector.load %arg1[%c0, %c0_0] : memref<8x32xf32, #tpu.memory_space<vmem>>, vector<8x32xf32>
    %c0_i32 = arith.constant 0 : i32
    %c2_i32 = arith.constant 2 : i32
    %1 = arith.addi %c0_i32, %c2_i32 : i32
    %c1_i32 = arith.constant 1 : i32
    %2 = scf.for %arg5 = %c0_i32 to %1 step %c1_i32 iter_args(%arg6 = %0) -> (vector<8x32xf32>)  : i32 {
      %4 = arith.index_cast %arg5 : i32 to index
      %c0_4 = arith.constant 0 : index
      %c0_5 = arith.constant 0 : index
      %5 = vector.load %arg2[%4, %c0_4, %c0_5] : memref<2x32x32xbf16, #tpu.memory_space<vmem>>, vector<1x32x32xbf16>
      %6 = vector.shape_cast %5 : vector<1x32x32xbf16> to vector<32x32xbf16>
      %7 = arith.index_cast %arg5 : i32 to index
      %c0_6 = arith.constant 0 : index
      %c0_7 = arith.constant 0 : index
      %8 = vector.load %arg3[%7, %c0_6, %c0_7] : memref<2x1x32xf32, #tpu.memory_space<vmem>>, vector<1x1x32xf32>
      %9 = vector.shape_cast %8 : vector<1x1x32xf32> to vector<1x32xf32>
      %10 = arith.truncf %arg6 : vector<8x32xf32> to vector<8x32xbf16>
      %cst = arith.constant dense<0.000000e+00> : vector<8x32xf32>
      %11 = tpu.matmul %10, %6, %cst {dimension_numbers = #tpu.dot_dimension_numbers<[1], [0], [0], [1], [0, 0, 1, 1], [], []>} : vector<8x32xbf16>, vector<32x32xbf16>, vector<8x32xf32> -> vector<8x32xf32>
      %12 = vector.broadcast %9 : vector<1x32xf32> to vector<8x32xf32>
      %13 = arith.addf %11, %12 : vector<8x32xf32>
      %cst_8 = arith.constant 0.000000e+00 : f32
      %14 = vector.broadcast %cst_8 : f32 to vector<8x32xf32>
      %15 = arith.subf %14, %13 : vector<8x32xf32>
      %16 = math.exp %15 : vector<8x32xf32>
      %cst_9 = arith.constant 1.000000e+00 : f32
      %17 = vector.broadcast %cst_9 : f32 to vector<8x32xf32>
      %18 = arith.addf %17, %16 : vector<8x32xf32>
      %19 = tpu.reciprocal %18 {approx = true} : vector<8x32xf32> -> vector<8x32xf32>
      %20 = arith.mulf %arg6, %19 : vector<8x32xf32>
      scf.yield %20 : vector<8x32xf32>
    }
    %c2_i32_1 = arith.constant 2 : i32
    %c0_2 = arith.constant 0 : index
    %c0_3 = arith.constant 0 : index
    %3 = vector.load %arg4[%c0_2, %c0_3] : memref<8x32xf32, #tpu.memory_space<vmem>>, vector<8x32xf32>
    tpu.vector_store %arg4[%c0_2, %c0_3], %2 {strides = array<i32>} : memref<8x32xf32, #tpu.memory_space<vmem>>, vector<8x32xf32>,
    return
  }
  func.func @transform_0(%arg0: i32) -> (i32, i32) {
    %c0_i32 = arith.constant 0 : i32
    %c0_i32_0 = arith.constant 0 : i32
    return %arg0, %c0_i32 : i32, i32
  }
  func.func @transform_1(%arg0: i32) -> (i32, i32, i32) {
    %c0_i32 = arith.constant 0 : i32
    %c0_i32_0 = arith.constant 0 : i32
    %c0_i32_1 = arith.constant 0 : i32
    %c0_i32_2 = arith.constant 0 : i32
    return %c0_i32, %c0_i32_0, %c0_i32_1 : i32, i32, i32
  }
  func.func @transform_2(%arg0: i32) -> (i32, i32, i32) {
    %c0_i32 = arith.constant 0 : i32
    %c0_i32_0 = arith.constant 0 : i32
    %c0_i32_1 = arith.constant 0 : i32
    %c0_i32_2 = arith.constant 0 : i32
    return %c0_i32, %c0_i32_0, %c0_i32_1 : i32, i32, i32
  }
  func.func @transform_3(%arg0: i32) -> (i32, i32) {
    %c0_i32 = arith.constant 0 : i32
    %c0_i32_0 = arith.constant 0 : i32
    return %arg0, %c0_i32 : i32, i32
  }
}

</mosaic_0001>

<bundles_post_ra>
// kernel: tpu_custom_call.1
= control target key start
LH: loop header
LB: loop body
LE: loop exit
PB: predicated region body
PF: predicated region fallthrough
CT: control target
= control target key end

     0   :  { %8 = vsyncpa [#allocation3], 0  ;;  %s892_s0 = inlined_call_operand.hbm [shape: f32[16,32], index: 0, kind: input, shape index: {}]   ;;  %s893_s1 = inlined_call_operand.hbm [shape: bf16[2,32,32], index: 1, kind: input, shape index: {}]   ;;  %s894_s2 = inlined_call_operand.vmem [shape: f32[2,1,32], index: 2, kind: input, shape index: {}]   ;;  %s895_s3 = inlined_call_operand.hbm [shape: f32[16,32], index: 3, kind: output, shape index: {}]  }
   0x1   :  { %10 = vsyncpa [#allocation3 + $0x1], 0 }
   0x2   :  { %11 = vsyncpa [#allocation6], 0 }
   0x3   :  { %12 = vsyncpa [#allocation4], 0 }
   0x4   :  { %14 = vsyncpa [#allocation4 + $0x1], 0  ;;  %s683_s12 = smov 0   ;;  %s685_s13 = smov 0  }
   0x5   :  { %s687_s14 = smov 0   ;;  %s689_s15 = smov 0  }
   0x6 LB: > { %s704_s16 = sadd.s32 4294967295, %s646_s15   ;;  %s395_s17 = sadd.s32 4294967294, %s646_s15   ;;  %s646_s15 = sphi %s689_s15, %s915_s15   ;;  %s642_s14 = sphi %s687_s14, %s914_s14   ;;  %s638_s13 = sphi %s685_s13, %s913_s13   ;;  %s634_s12 = sphi %s683_s12, %s912_s12  }
   0x7   : > { %p40_p0 = scmp.ne.s32.totalorder %s638_s13, %s634_s12  ;;  %p896_p1 = scmp.eq.s32.totalorder %s704_s16, 0 }
   0x8   : > { %p112_p3 = scmp.eq.s32.totalorder %s395_s17, 1  ;;  %p396_p5 = scmp.ge.s32.totalorder %s646_s15, 1 }
   0x9   : > { %p713_p4 = por %p896_p1, %p40_p0  ;;  %p119_p7 = scmp.lt.s32.totalorder %s646_s15, 3 }
   0xa   : > { %p718_p6 = por %p112_p3, %p40_p0  ;;  %s656_s21 = smov [#allocation5]  }
   0xb   : > { %s899_s18 = scalar_select %p713_p4, 1, 0 }
   0xc   : > { %s900_s19 = scalar_select %p718_p6, 1, 0 }
   0xd   : > { %p723_p8 = pnand %p396_p5, %p119_p7  ;;  %s131_s22 = sshll.u32 %s656_s21, 4  ;;  %s727_s22 = int_to_ptr.vmem [resolvable:$true] %s131_s22 }
   0xe   : > { %s739_s24 = sadd.s32 1, %s646_s15   ;;  %s27_s25 = sadd.s32 1, %s642_s14 }
   0xf   : > { %s901_s20 = scalar_select %p723_p8, 1, 0 }
  0x10   : > { %p435_p9 = pneg %p723_p8  ;;  %s24_s26 = ssub.s32 %s646_s15, %s739_s24 }
  0x11   : > { %s510_s29 = scalar_lea.hbm %s893_s1, 512 }
  0x12   : > { %p734_p11 = pnand %p435_p9, %p896_p1  ;;  %p511_p12 = scmp.ne.s32.totalorder %s893_s1, %s510_s29 }
  0x13   : > { %p517_p5 = scmp.lt.u32.totalorder %s510_s29, %s893_s1 }
  0x14   : > { %p512_p13 = pneg %p734_p11 }
  0x16   : > { %p513_p0 = pnand %p512_p13, %p511_p12 }
  0x18   : > { %p514_p3 = pneg %p513_p0 }
  0x1a   : > { %p519_p7 = pnand %p517_p5, %p514_p3 }
  0x1c   : > { %522 = shalt.err (!%p519_p7)
}
  0x1d   : > { %s523_s7 = scalar_lea.vmem %s727_s22, 512  ;;  %p531_p2 = scmp.lt.s32.totalorder %s727_s22, %s727_s22 }
  0x1e   : > { %p524_p9 = scmp.ne.s32.totalorder %s727_s22, %s523_s7  ;;  %p532_p6 = scmp.lt.s32.totalorder %s523_s7, %s523_s7 }
  0x20   : > { %p526_p10 = pnand %p524_p9, %p512_p13  ;;  %p533_p4 = por %p532_p6, %p531_p2 }
  0x22   : > { %p527_p1 = pneg %p526_p10 }
  0x24   : > { %p534_p8 = pnand %p533_p4, %p527_p1 }
  0x26   : > { %537 = shalt.err (!%p534_p8)
}
  0x27   : > { %s657_s8 = smov 64   ;;  %s658_s9 = smov 4  }
  0x28   : > { %438 = dma.hbm_to_vmem [thread:$0]  (!%p734_p11), %s893_s1, 512, %s727_s22, [#allocation6], %s657_s8, %s657_s8, %s658_s9  }
  0x29   : > { %p25_p2 = scmp.eq.s32.totalorder %s24_s26, 0  ;;  %p34_p1 = scmp.ne.s32.totalorder %s642_s14, %s638_s13 }
  0x2a   : > { %p35_p4 = scmp.eq.s32.totalorder %s646_s15, 0  ;;  %p448_p6 = scmp.lt.s32.totalorder %s646_s15, 2 }
  0x2b   : > { %s770_s17 = scalar_select %p25_p2, %s642_s14, %s27_s25  }
  0x2c   : > { %p36_p8 = por %p35_p4, %p34_p1  ;;  %p903_p10 = scmp.eq.s32.totalorder %s704_s16, 1 }
  0x2d   : > { %s148_s27 = sand.u32 1, %s642_s14   ;;  %s400_s28 = sshll.u32 %s646_s15, 7 }
  0x2e   : > { %p774_p12 = por %p903_p10, %p34_p1  ;;  %s399_s29 = sshll.u32 %s148_s27, 3 }
  0x2f   : > { %s783_s4 = scalar_lea.hbm %s892_s0, %s400_s28  ;;  %s152_s22 = scalar_lea.vmem [#allocation2], %s399_s29 }
  0x30   : > { %s159_s25 = sshll.u32 %s152_s22, 4  ;;  %p785_p11 = pnand %p448_p6, %p36_p8  ;;  %s789_s25 = int_to_ptr.vmem [resolvable:$true] %s159_s25 }
  0x31   : > { %s149_s5 = scalar_lea.sflag [#allocation3], %s148_s27  ;;  %s538_s6 = scalar_lea.hbm %s783_s4, 128 }
  0x32   : > { %p539_p13 = scmp.ne.s32.totalorder %s783_s4, %s538_s6  ;;  %p540_p0 = pneg %p785_p11 }
  0x33   : > { %s543_s9 = scalar_lea.hbm %s892_s0, 256  ;;  %p544_p7 = scmp.lt.u32.totalorder %s783_s4, %s892_s0 }
  0x34   : > { %p541_p3 = pnand %p540_p0, %p539_p13  ;;  %p545_p9 = scmp.lt.u32.totalorder %s543_s9, %s538_s6 }
  0x35   : > { %p547_p1 = scmp.lt.u32.totalorder %s538_s6, %s783_s4 }
  0x36   : > { %p542_p5 = pneg %p541_p3  ;;  %p546_p2 = por %p545_p9, %p544_p7 }
  0x38   : > { %p548_p4 = por %p547_p1, %p546_p2 }
  0x3a   : > { %p549_p6 = pnand %p548_p4, %p542_p5 }
  0x3c   : > { %552 = shalt.err (!%p549_p6)
}
  0x3d   : > { %s553_s27 = scalar_lea.vmem %s789_s25, 128  ;;  %s659_s28 = smov [#allocation2]  }
  0x3e   : > { %p554_p8 = scmp.ne.s32.totalorder %s789_s25, %s553_s27  ;;  %s558_s29 = sshll.u32 %s659_s28, 4  ;;  %s559_s29 = int_to_ptr.vmem [resolvable:$false] %s558_s29 }
  0x3f   : > { %s560_s23 = scalar_lea.vmem %s559_s29, 256  ;;  %p561_p3 = scmp.lt.s32.totalorder %s789_s25, %s559_s29 }
  0x40   : > { %p556_p10 = pnand %p554_p8, %p540_p0  ;;  %p562_p7 = scmp.lt.s32.totalorder %s560_s23, %s553_s27 }
  0x42   : > { %p557_p13 = pneg %p556_p10  ;;  %p563_p9 = por %p562_p7, %p561_p3 }
  0x44   : > { %p564_p2 = pnand %p563_p9, %p557_p13 }
  0x46   : > { %567 = shalt.err (!%p564_p2)
}
  0x47   : > { %442 = dma.hbm_to_vmem [thread:$0]  (!%p785_p11), %s783_s4, 128, %s789_s25, %s149_s5  }
  0x48   : > { %p906_p5 = scmp.ne.s32.totalorder %s901_s20, 0 }
  0x49   : > { %s819_s30 = sand.u32 (!%p906_p5), 1, %s638_s13   ;;  %p907_p0 = scmp.ne.s32.totalorder (!%p906_p5), %s899_s18, 0 }
  0x4a   : > { %168 = sbr.rel (%p906_p5) target bundleno = 355 (0x163), region = 32  ;;  %s402_s22 = sshll.u32 (!%p906_p5), %s819_s30, 3 }
  0x4b   : > { %s171_s6 = scalar_lea.sflag (!%p906_p5), [#allocation3], %s819_s30  ;;  %s174_s7 = scalar_lea.vmem (!%p906_p5), [#allocation2], %s402_s22 }
  0x51   : > { %621 = dma.done.wait (%p907_p0), %s171_s6, 128  }
  0x52   : > { %623 = vsyncadd (%p907_p0), %s171_s6, 4294967168  ;;  %p908_p1 = scmp.eq.s32.totalorder %s704_s16, 0 }
  0x54   : > { %625 = dma.done.wait (%p908_p1), [#allocation6], 512   ;;  %p909_p11 = pmov %p908_p1 }
  0x55   : > { %v202_v0 = vld [vmem:[%s174_s7] sm:$0xff]   ;;  %s831_s20 = scalar_lea.vmem [#allocation7], %s402_s22  ;;  %s833_s4 = smov 0  }
  0x56   : > { %627 = vsyncadd (%p909_p11), [#allocation6], 4294966784  ;;  %v648_v1 = vmov %v202_v0  }
  0x57 LB: >> { %v660_v2 = vmov 0.0   ;;  %vm661_vm0 = vmmov 0   ;;  %s415_s18 = sshll.u32 %s654_s4, 4  ;;  %v219_v5 = vpack.c.bf16 %v650_v1, %v650_v1  ;;  %vm238_vm1 = vcmask 261120   ;;  %s217_s8 = scalar_lea.vmem %s894_s2, %s654_s4  ;;  %s654_s4 = sphi %s833_s4, %s208_s4   ;;  %v650_v1 = vphi %v648_v1, %v649_v1  }
  0x58   : >> { %419 = vmatprep.subr.bf16.mxu0 %v660_v2  ;;  %423 = vmatprep.mubr.msk.bf16.mxu0 %vm661_vm0, %v660_v2  ;;  %s212_s25 = scalar_lea.vmem [#allocation5], %s415_s18  ;;  %v407_v6 = vld [vmem:[%s217_s8] ss:$0 sm:$0xff]  ;;  %s208_s4 = sadd.s32 1, %s654_s4  }
  0x59   : >> { %v504_v3 = vld [vmem:[%s212_s25] sm:$0xff]   ;;  %v505_v4 = vld [vmem:[%s212_s25 + $0x8] sm:$0xff]   ;;  %p205_p4 = scmp.ge.s32.totalorder %s208_s4, 2  }
  0x5a   : >> { %420 = vmatpush3.bf16.msra.mxu0 %v504_v3  ;;  %s412_s9 = sshll.u32 (%p205_p4), %s704_s16, 7  ;;  %s304_s28 = sshll.u32 (%p205_p4), %s831_s20, 4  ;;  %s305_s28 = int_to_ptr.vmem [resolvable:$true] %s304_s28 }
  0x5b   : >> { %421 = vmatprep.subr.bf16.mxu0 %v660_v2  ;;  %s853_s27 = scalar_lea.hbm (%p205_p4), %s895_s3, %s412_s9  ;;  %s291_s29 = scalar_lea.sflag (%p205_p4), [#allocation4], %s819_s30 }
  0x5c   : > { %s568_s23 = scalar_lea.vmem (%p205_p4), %s305_s28, 128  ;;  %s662_s22 = smov (%p205_p4), [#allocation7]  }
  0x5d   : > { %p569_p6 = scmp.ne.s32.totalorder (%p205_p4), %s305_s28, %s568_s23  ;;  %s572_s6 = sshll.u32 (%p205_p4), %s662_s22, 4  ;;  %s573_s6 = int_to_ptr.vmem [resolvable:$false] %s572_s6 }
  0x5e   : >> { %422 = vmatpush3.bf16.msra.mxu0 %v505_v4  ;;  %s574_s7 = scalar_lea.vmem (%p205_p4), %s573_s6, 256  ;;  %p575_p13 = scmp.lt.s32.totalorder (%p205_p4), %s305_s28, %s573_s6 }
  0x5f   : > { %p570_p8 = pnand (%p205_p4), %p569_p6, %p774_p12  ;;  %p576_p3 = scmp.lt.s32.totalorder (%p205_p4), %s574_s7, %s568_s23 }
  0x61   : >> { %424 = vmatmul.mubr.msk.bf16.vlgmr.msra.gmra.mrb[0].mxu0 %vm238_vm1, %v219_v5  ;;  %p571_p10 = pneg (%p205_p4), %p570_p8  ;;  %p577_p7 = por (%p205_p4), %p576_p3, %p575_p13 }
  0x63   : > { %p578_p9 = pnand (%p205_p4), %p577_p7, %p571_p10 }
 0x134   : >> { %v276_v7 = vpop.f32.mrb[0].mxu0 }
 0x135   : >> { %v277_v8 = vadd.f32 %v407_v6, %v276_v7  ;;  %v425_v9 = vpop.f32.mrb[1].mxu0 }
 0x136   : >> { %v279_v10 = vpop.f32.mrb[2].mxu0 }
 0x137   : >> { %v282_v11 = vsub.f32 0.0, %v277_v8  ;;  %v426_v12 = vpop.f32.mrb[3].mxu0 }
 0x139   : >> { %v283_v13 = vmul.f32 1.442695, %v282_v11 }
 0x13b   : >> { %506 = vpow2.f32 %v283_v13 }
 0x145   : >> { %v507_v14 = vpop.eup %506 }
 0x146   : >> { %v285_v15 = vadd.f32 1.0, %v507_v14 }
 0x148   : >> { %508 = vrcp.f32 %v285_v15 }
 0x14f   : > { %207 = sbr.rel (!%p205_p4) target bundleno = 87 (0x57), region = 90 }
 0x152   : >> { %v509_v16 = vpop.eup %508 }
 0x153   : >> { %v287_v17 = vmul.f32 %v650_v1, %v509_v16  }
 0x155   : >> { %v649_v1 = vmov %v287_v17   ;;  %289 = vst.msk [vmem:[%s831_s20] sm:$0xff] (%p205_p4), %vm238_vm1, %v287_v17 }
 0x156   : > { %581 = shalt.err (!%p578_p9)
}
 0x157   : > { %s582_s16 = scalar_lea.hbm %s853_s27, 128  ;;  %s586_s4 = scalar_lea.hbm %s895_s3, 256 }
 0x158   : > { %p583_p2 = scmp.ne.s32.totalorder %s853_s27, %s582_s16  ;;  %p587_p1 = scmp.lt.u32.totalorder %s853_s27, %s895_s3 }
 0x159   : > { %p588_p11 = scmp.lt.u32.totalorder %s586_s4, %s582_s16  ;;  %p590_p6 = scmp.lt.u32.totalorder %s582_s16, %s853_s27 }
 0x15a   : > { %p584_p5 = pnand %p583_p2, %p774_p12 }
 0x15b   : > { %p589_p4 = por %p588_p11, %p587_p1 }
 0x15c   : > { %p585_p0 = pneg %p584_p5 }
 0x15d   : > { %p591_p8 = por %p590_p6, %p589_p4 }
 0x15f   : > { %p592_p10 = pnand %p591_p8, %p585_p0 }
 0x161   : > { %595 = shalt.err (!%p592_p10)
}
 0x162   : > { %433 = dma.vmem_to_hbm [thread:$0]  (%p774_p12), %s305_s28, 128, %s853_s27, %s291_s29  }
 0x163 PF: > { %s316_s26 = sand.u32 1, %s634_s12   ;;  %p910_p13 = scmp.ne.s32.totalorder %s900_s19, 0 }
 0x164   : > { %p911_p3 = scmp.ge.s32.totalorder %s646_s15, 2  ;;  %s317_s5 = scalar_lea.sflag [#allocation4], %s316_s26 }
 0x166   : > { %p444_p7 = pnand %p911_p3, %p910_p13 }
 0x168   : > { %629 = dma.done.wait (!%p444_p7), %s317_s5, 128  }
 0x169   : > { %631 = vsyncadd (!%p444_p7), %s317_s5, 4294967168  ;;  %p17_p9 = scmp.ge.s32.totalorder %s739_s24, 4   ;;  %s912_s12 = smov %s638_s13 }
 0x16a   : > { %s913_s13 = smov %s642_s14  ;;  %s914_s14 = smov %s770_s17 }
 0x16b   : > { %s915_s15 = smov %s739_s24  ;;  %19 = sbr.rel (!%p17_p9) target bundleno = 6 (0x6), region = 101 }
 0x172   :  { %322 = vsyncpa [#allocation3], 1 }
 0x173   :  { %324 = vsyncpa [#allocation3 + $0x1], 1 }
 0x174   :  { %325 = vsyncpa [#allocation6], 1 }
 0x175   :  { %326 = vsyncpa [#allocation4], 1 }
 0x176   :  { %328 = vsyncpa [#allocation4 + $0x1], 1 }

// kernel: tpu_custom_call.1
= control target key start
LH: loop header
LB: loop body
LE: loop exit
PB: predicated region body
PF: predicated region fallthrough
CT: control target
= control target key end

     0   :  { %8 = vsyncpa [#allocation3], 0  ;;  %s892_s0 = inlined_call_operand.hbm [shape: f32[16,32], index: 0, kind: input, shape index: {}]   ;;  %s893_s1 = inlined_call_operand.hbm [shape: bf16[2,32,32], index: 1, kind: input, shape index: {}]   ;;  %s894_s2 = inlined_call_operand.vmem [shape: f32[2,1,32], index: 2, kind: input, shape index: {}]   ;;  %s895_s3 = inlined_call_operand.hbm [shape: f32[16,32], index: 3, kind: output, shape index: {}]  }
   0x1   :  { %10 = vsyncpa [#allocation3 + $0x1], 0 }
   0x2   :  { %11 = vsyncpa [#allocation6], 0 }
   0x3   :  { %12 = vsyncpa [#allocation4], 0 }
   0x4   :  { %14 = vsyncpa [#allocation4 + $0x1], 0  ;;  %s683_s12 = smov 0   ;;  %s685_s13 = smov 0  }
   0x5   :  { %s687_s14 = smov 0   ;;  %s689_s15 = smov 0  }
   0x6 LB: > { %s704_s16 = sadd.s32 4294967295, %s646_s15   ;;  %s395_s17 = sadd.s32 4294967294, %s646_s15   ;;  %s646_s15 = sphi %s689_s15, %s915_s15   ;;  %s642_s14 = sphi %s687_s14, %s914_s14   ;;  %s638_s13 = sphi %s685_s13, %s913_s13   ;;  %s634_s12 = sphi %s683_s12, %s912_s12  }
   0x7   : > { %p40_p0 = scmp.ne.s32.totalorder %s638_s13, %s634_s12  ;;  %p896_p1 = scmp.eq.s32.totalorder %s704_s16, 0 }
   0x8   : > { %p112_p3 = scmp.eq.s32.totalorder %s395_s17, 1  ;;  %p396_p5 = scmp.ge.s32.totalorder %s646_s15, 1 }
   0x9   : > { %p713_p4 = por %p896_p1, %p40_p0  ;;  %p119_p7 = scmp.lt.s32.totalorder %s646_s15, 3 }
   0xa   : > { %p718_p6 = por %p112_p3, %p40_p0  ;;  %s656_s21 = smov [#allocation5]  }
   0xb   : > { %s899_s18 = scalar_select %p713_p4, 1, 0 }
   0xc   : > { %s900_s19 = scalar_select %p718_p6, 1, 0 }
   0xd   : > { %p723_p8 = pnand %p396_p5, %p119_p7  ;;  %s131_s22 = sshll.u32 %s656_s21, 4  ;;  %s727_s22 = int_to_ptr.vmem [resolvable:$true] %s131_s22 }
   0xe   : > { %s739_s24 = sadd.s32 1, %s646_s15   ;;  %s27_s25 = sadd.s32 1, %s642_s14 }
   0xf   : > { %s901_s20 = scalar_select %p723_p8, 1, 0 }
  0x10   : > { %p435_p9 = pneg %p723_p8  ;;  %s24_s26 = ssub.s32 %s646_s15, %s739_s24 }
  0x11   : > { %s510_s29 = scalar_lea.hbm %s893_s1, 512 }
  0x12   : > { %p734_p11 = pnand %p435_p9, %p896_p1  ;;  %p511_p12 = scmp.ne.s32.totalorder %s893_s1, %s510_s29 }
  0x13   : > { %p517_p5 = scmp.lt.u32.totalorder %s510_s29, %s893_s1 }
  0x14   : > { %p512_p13 = pneg %p734_p11 }
  0x16   : > { %p513_p0 = pnand %p512_p13, %p511_p12 }
  0x18   : > { %p514_p3 = pneg %p513_p0 }
  0x1a   : > { %p519_p7 = pnand %p517_p5, %p514_p3 }
  0x1c   : > { %522 = shalt.err (!%p519_p7)
}
  0x1d   : > { %s523_s7 = scalar_lea.vmem %s727_s22, 512  ;;  %p531_p2 = scmp.lt.s32.totalorder %s727_s22, %s727_s22 }
  0x1e   : > { %p524_p9 = scmp.ne.s32.totalorder %s727_s22, %s523_s7  ;;  %p532_p6 = scmp.lt.s32.totalorder %s523_s7, %s523_s7 }
  0x20   : > { %p526_p10 = pnand %p524_p9, %p512_p13  ;;  %p533_p4 = por %p532_p6, %p531_p2 }
  0x22   : > { %p527_p1 = pneg %p526_p10 }
  0x24   : > { %p534_p8 = pnand %p533_p4, %p527_p1 }
  0x26   : > { %537 = shalt.err (!%p534_p8)
}
  0x27   : > { %s657_s8 = smov 64   ;;  %s658_s9 = smov 4  }
  0x28   : > { %438 = dma.hbm_to_vmem [thread:$0]  (!%p734_p11), %s893_s1, 512, %s727_s22, [#allocation6], %s657_s8, %s657_s8, %s658_s9  }
  0x29   : > { %p25_p2 = scmp.eq.s32.totalorder %s24_s26, 0  ;;  %p34_p1 = scmp.ne.s32.totalorder %s642_s14, %s638_s13 }
  0x2a   : > { %p35_p4 = scmp.eq.s32.totalorder %s646_s15, 0  ;;  %p448_p6 = scmp.lt.s32.totalorder %s646_s15, 2 }
  0x2b   : > { %s770_s17 = scalar_select %p25_p2, %s642_s14, %s27_s25  }
  0x2c   : > { %p36_p8 = por %p35_p4, %p34_p1  ;;  %p903_p10 = scmp.eq.s32.totalorder %s704_s16, 1 }
  0x2d   : > { %s148_s27 = sand.u32 1, %s642_s14   ;;  %s400_s28 = sshll.u32 %s646_s15, 7 }
  0x2e   : > { %p774_p12 = por %p903_p10, %p34_p1  ;;  %s399_s29 = sshll.u32 %s148_s27, 3 }
  0x2f   : > { %s783_s4 = scalar_lea.hbm %s892_s0, %s400_s28  ;;  %s152_s22 = scalar_lea.vmem [#allocation2], %s399_s29 }
  0x30   : > { %s159_s25 = sshll.u32 %s152_s22, 4  ;;  %p785_p11 = pnand %p448_p6, %p36_p8  ;;  %s789_s25 = int_to_ptr.vmem [resolvable:$true] %s159_s25 }
  0x31   : > { %s149_s5 = scalar_lea.sflag [#allocation3], %s148_s27  ;;  %s538_s6 = scalar_lea.hbm %s783_s4, 128 }
  0x32   : > { %p539_p13 = scmp.ne.s32.totalorder %s783_s4, %s538_s6  ;;  %p540_p0 = pneg %p785_p11 }
  0x33   : > { %s543_s9 = scalar_lea.hbm %s892_s0, 256  ;;  %p544_p7 = scmp.lt.u32.totalorder %s783_s4, %s892_s0 }
  0x34   : > { %p541_p3 = pnand %p540_p0, %p539_p13  ;;  %p545_p9 = scmp.lt.u32.totalorder %s543_s9, %s538_s6 }
  0x35   : > { %p547_p1 = scmp.lt.u32.totalorder %s538_s6, %s783_s4 }
  0x36   : > { %p542_p5 = pneg %p541_p3  ;;  %p546_p2 = por %p545_p9, %p544_p7 }
  0x38   : > { %p548_p4 = por %p547_p1, %p546_p2 }
  0x3a   : > { %p549_p6 = pnand %p548_p4, %p542_p5 }
  0x3c   : > { %552 = shalt.err (!%p549_p6)
}
  0x3d   : > { %s553_s27 = scalar_lea.vmem %s789_s25, 128  ;;  %s659_s28 = smov [#allocation2]  }
  0x3e   : > { %p554_p8 = scmp.ne.s32.totalorder %s789_s25, %s553_s27  ;;  %s558_s29 = sshll.u32 %s659_s28, 4  ;;  %s559_s29 = int_to_ptr.vmem [resolvable:$false] %s558_s29 }
  0x3f   : > { %s560_s23 = scalar_lea.vmem %s559_s29, 256  ;;  %p561_p3 = scmp.lt.s32.totalorder %s789_s25, %s559_s29 }
  0x40   : > { %p556_p10 = pnand %p554_p8, %p540_p0  ;;  %p562_p7 = scmp.lt.s32.totalorder %s560_s23, %s553_s27 }
  0x42   : > { %p557_p13 = pneg %p556_p10  ;;  %p563_p9 = por %p562_p7, %p561_p3 }
  0x44   : > { %p564_p2 = pnand %p563_p9, %p557_p13 }
  0x46   : > { %567 = shalt.err (!%p564_p2)
}
  0x47   : > { %442 = dma.hbm_to_vmem [thread:$0]  (!%p785_p11), %s783_s4, 128, %s789_s25, %s149_s5  }
  0x48   : > { %p906_p5 = scmp.ne.s32.totalorder %s901_s20, 0 }
  0x49   : > { %s819_s30 = sand.u32 (!%p906_p5), 1, %s638_s13   ;;  %p907_p0 = scmp.ne.s32.totalorder (!%p906_p5), %s899_s18, 0 }
  0x4a   : > { %168 = sbr.rel (%p906_p5) target bundleno = 355 (0x163), region = 32  ;;  %s402_s22 = sshll.u32 (!%p906_p5), %s819_s30, 3 }
  0x4b   : > { %s171_s6 = scalar_lea.sflag (!%p906_p5), [#allocation3], %s819_s30  ;;  %s174_s7 = scalar_lea.vmem (!%p906_p5), [#allocation2], %s402_s22 }
  0x51   : > { %621 = dma.done.wait (%p907_p0), %s171_s6, 128  }
  0x52   : > { %623 = vsyncadd (%p907_p0), %s171_s6, 4294967168  ;;  %p908_p1 = scmp.eq.s32.totalorder %s704_s16, 0 }
  0x54   : > { %625 = dma.done.wait (%p908_p1), [#allocation6], 512   ;;  %p909_p11 = pmov %p908_p1 }
  0x55   : > { %v202_v0 = vld [vmem:[%s174_s7] sm:$0xff]   ;;  %s831_s20 = scalar_lea.vmem [#allocation7], %s402_s22  ;;  %s833_s4 = smov 0  }
  0x56   : > { %627 = vsyncadd (%p909_p11), [#allocation6], 4294966784  ;;  %v648_v1 = vmov %v202_v0  }
  0x57 LB: >> { %v660_v2 = vmov 0.0   ;;  %vm661_vm0 = vmmov 0   ;;  %s415_s18 = sshll.u32 %s654_s4, 4  ;;  %v219_v5 = vpack.c.bf16 %v650_v1, %v650_v1  ;;  %vm238_vm1 = vcmask 261120   ;;  %s217_s8 = scalar_lea.vmem %s894_s2, %s654_s4  ;;  %s654_s4 = sphi %s833_s4, %s208_s4   ;;  %v650_v1 = vphi %v648_v1, %v649_v1  }
  0x58   : >> { %419 = vmatprep.subr.bf16.mxu0 %v660_v2  ;;  %423 = vmatprep.mubr.msk.bf16.mxu0 %vm661_vm0, %v660_v2  ;;  %s212_s25 = scalar_lea.vmem [#allocation5], %s415_s18  ;;  %v407_v6 = vld [vmem:[%s217_s8] ss:$0 sm:$0xff]  ;;  %s208_s4 = sadd.s32 1, %s654_s4  }
  0x59   : >> { %v504_v3 = vld [vmem:[%s212_s25] sm:$0xff]   ;;  %v505_v4 = vld [vmem:[%s212_s25 + $0x8] sm:$0xff]   ;;  %p205_p4 = scmp.ge.s32.totalorder %s208_s4, 2  }
  0x5a   : >> { %420 = vmatpush3.bf16.msra.mxu0 %v504_v3  ;;  %s412_s9 = sshll.u32 (%p205_p4), %s704_s16, 7  ;;  %s304_s28 = sshll.u32 (%p205_p4), %s831_s20, 4  ;;  %s305_s28 = int_to_ptr.vmem [resolvable:$true] %s304_s28 }
  0x5b   : >> { %421 = vmatprep.subr.bf16.mxu0 %v660_v2  ;;  %s853_s27 = scalar_lea.hbm (%p205_p4), %s895_s3, %s412_s9  ;;  %s291_s29 = scalar_lea.sflag (%p205_p4), [#allocation4], %s819_s30 }
  0x5c   : > { %s568_s23 = scalar_lea.vmem (%p205_p4), %s305_s28, 128  ;;  %s662_s22 = smov (%p205_p4), [#allocation7]  }
  0x5d   : > { %p569_p6 = scmp.ne.s32.totalorder (%p205_p4), %s305_s28, %s568_s23  ;;  %s572_s6 = sshll.u32 (%p205_p4), %s662_s22, 4  ;;  %s573_s6 = int_to_ptr.vmem [resolvable:$false] %s572_s6 }
  0x5e   : >> { %422 = vmatpush3.bf16.msra.mxu0 %v505_v4  ;;  %s574_s7 = scalar_lea.vmem (%p205_p4), %s573_s6, 256  ;;  %p575_p13 = scmp.lt.s32.totalorder (%p205_p4), %s305_s28, %s573_s6 }
  0x5f   : > { %p570_p8 = pnand (%p205_p4), %p569_p6, %p774_p12  ;;  %p576_p3 = scmp.lt.s32.totalorder (%p205_p4), %s574_s7, %s568_s23 }
  0x61   : >> { %424 = vmatmul.mubr.msk.bf16.vlgmr.msra.gmra.mrb[0].mxu0 %vm238_vm1, %v219_v5  ;;  %p571_p10 = pneg (%p205_p4), %p570_p8  ;;  %p577_p7 = por (%p205_p4), %p576_p3, %p575_p13 }
  0x63   : > { %p578_p9 = pnand (%p205_p4), %p577_p7, %p571_p10 }
 0x134   : >> { %v276_v7 = vpop.f32.mrb[0].mxu0 }
 0x135   : >> { %v277_v8 = vadd.f32 %v407_v6, %v276_v7  ;;  %v425_v9 = vpop.f32.mrb[1].mxu0 }
 0x136   : >> { %v279_v10 = vpop.f32.mrb[2].mxu0 }
 0x137   : >> { %v282_v11 = vsub.f32 0.0, %v277_v8  ;;  %v426_v12 = vpop.f32.mrb[3].mxu0 }
 0x139   : >> { %v283_v13 = vmul.f32 1.442695, %v282_v11 }
 0x13b   : >> { %506 = vpow2.f32 %v283_v13 }
 0x145   : >> { %v507_v14 = vpop.eup %506 }
 0x146   : >> { %v285_v15 = vadd.f32 1.0, %v507_v14 }
 0x148   : >> { %508 = vrcp.f32 %v285_v15 }
 0x14f   : > { %207 = sbr.rel (!%p205_p4) target bundleno = 87 (0x57), region = 90 }
 0x152   : >> { %v509_v16 = vpop.eup %508 }
 0x153   : >> { %v287_v17 = vmul.f32 %v650_v1, %v509_v16  }
 0x155   : >> { %v649_v1 = vmov %v287_v17   ;;  %289 = vst.msk [vmem:[%s831_s20] sm:$0xff] (%p205_p4), %vm238_vm1, %v287_v17 }
 0x156   : > { %581 = shalt.err (!%p578_p9)
}
 0x157   : > { %s582_s16 = scalar_lea.hbm %s853_s27, 128  ;;  %s586_s4 = scalar_lea.hbm %s895_s3, 256 }
 0x158   : > { %p583_p2 = scmp.ne.s32.totalorder %s853_s27, %s582_s16  ;;  %p587_p1 = scmp.lt.u32.totalorder %s853_s27, %s895_s3 }
 0x159   : > { %p588_p11 = scmp.lt.u32.totalorder %s586_s4, %s582_s16  ;;  %p590_p6 = scmp.lt.u32.totalorder %s582_s16, %s853_s27 }
 0x15a   : > { %p584_p5 = pnand %p583_p2, %p774_p12 }
 0x15b   : > { %p589_p4 = por %p588_p11, %p587_p1 }
 0x15c   : > { %p585_p0 = pneg %p584_p5 }
 0x15d   : > { %p591_p8 = por %p590_p6, %p589_p4 }
 0x15f   : > { %p592_p10 = pnand %p591_p8, %p585_p0 }
 0x161   : > { %595 = shalt.err (!%p592_p10)
}
 0x162   : > { %433 = dma.vmem_to_hbm [thread:$0]  (%p774_p12), %s305_s28, 128, %s853_s27, %s291_s29  }
 0x163 PF: > { %s316_s26 = sand.u32 1, %s634_s12   ;;  %p910_p13 = scmp.ne.s32.totalorder %s900_s19, 0 }
 0x164   : > { %p911_p3 = scmp.ge.s32.totalorder %s646_s15, 2  ;;  %s317_s5 = scalar_lea.sflag [#allocation4], %s316_s26 }
 0x166   : > { %p444_p7 = pnand %p911_p3, %p910_p13 }
 0x168   : > { %629 = dma.done.wait (!%p444_p7), %s317_s5, 128  }
 0x169   : > { %631 = vsyncadd (!%p444_p7), %s317_s5, 4294967168  ;;  %p17_p9 = scmp.ge.s32.totalorder %s739_s24, 4   ;;  %s912_s12 = smov %s638_s13 }
 0x16a   : > { %s913_s13 = smov %s642_s14  ;;  %s914_s14 = smov %s770_s17 }
 0x16b   : > { %s915_s15 = smov %s739_s24  ;;  %19 = sbr.rel (!%p17_p9) target bundleno = 6 (0x6), region = 101 }
 0x172   :  { %322 = vsyncpa [#allocation3], 1 }
 0x173   :  { %324 = vsyncpa [#allocation3 + $0x1], 1 }
 0x174   :  { %325 = vsyncpa [#allocation6], 1 }
 0x175   :  { %326 = vsyncpa [#allocation4], 1 }
 0x176   :  { %328 = vsyncpa [#allocation4 + $0x1], 1 }

</bundles_post_ra>
